<compile_context>
chip_gen: v5e
topology: v5e:2x2
jax: 0.10.0
libtpu: 0.0.40
codegen_flags: <defaults>
</compile_context>

<pallas_src>
import functools

import jax
import jax.numpy as jnp
from jax.experimental import pallas as pl
from jax.experimental.pallas import tpu as pltpu


def _round_up(x: int, m: int) -> int:
    return ((x + m - 1) // m) * m


def _reward_mlp_kernel(s_ref, ad_ref, ns_ref,
                       w1s_ref, w1ad_ref, w1ns_ref, b1_ref,
                       w2_ref, b2_ref, w3_ref, b3_ref,
                       out_ref):
    """One batch tile of the RewardNet MLP (bf16 MXU matmuls, f32 accumulate)."""
    # Layer 1: split matmuls reproduce concat([state, action, next_state, done]) @ W1
    # exactly; `done` is folded into the action stream as an extra column/row.
    h1 = jnp.dot(s_ref[...], w1s_ref[...], preferred_element_type=jnp.float32)
    h1 = h1 + jnp.dot(ad_ref[...], w1ad_ref[...],
                      preferred_element_type=jnp.float32)
    h1 = h1 + jnp.dot(ns_ref[...], w1ns_ref[...],
                      preferred_element_type=jnp.float32)
    h1 = jnp.maximum(h1 + b1_ref[...], 0.0)                    # (TB, Hp) f32

    # Layer 2.
    h2 = jnp.dot(h1.astype(jnp.bfloat16), w2_ref[...],
                 preferred_element_type=jnp.float32)
    h2 = jnp.maximum(h2 + b2_ref[...], 0.0)                    # (TB, Hp) f32

    # Head: tiny MXU matmul against the (Hp, 1) weight column -> (TB, 1) block.
    r = jnp.dot(h2.astype(jnp.bfloat16), w3_ref[...],
                preferred_element_type=jnp.float32)
    out_ref[...] = r + b3_ref[...]


@functools.partial(jax.jit, static_argnames=("tile_batch",))
def reward_net_forward(state, action, next_state, done, params,
                       *, tile_batch=4096):
    """JAX wrapper: parameter prep + batch-tiled Pallas MLP kernel.

    tile_batch knobs (per perf review): v6e -> 4096-8192 (raise vmem_limit_bytes
    accordingly), v7x -> 2048-4096 and keep >= 2 tiles so both TCs are used,
    v5e -> 2048-4096 with the explicit vmem_limit below.
    """
    w1, b1, w2, b2, w3, b3 = params
    B, obs_dim = state.shape
    act_dim = action.shape[1]
    hidden = w1.shape[1]

    # --- parameter preparation (tiny) ---------------------------------------
    Hp = max(128, _round_up(hidden, 128))        # full 128-lane vregs
    pad_h = Hp - hidden

    w1f = w1.astype(jnp.float32)
    # Row layout of W1 follows concat([state, action, next_state, done]).
    w1_s = jnp.pad(w1f[:obs_dim], ((0, 0), (0, pad_h))).astype(jnp.bfloat16)
    w1_ad = jnp.pad(
        jnp.concatenate([w1f[obs_dim:obs_dim + act_dim],            # action rows
                         w1f[obs_dim + act_dim + obs_dim:]],        # done row
                        axis=0),
        ((0, 0), (0, pad_h))).astype(jnp.bfloat16)
    w1_ns = jnp.pad(w1f[obs_dim + act_dim:obs_dim + act_dim + obs_dim],
                    ((0, 0), (0, pad_h))).astype(jnp.bfloat16)
    b1_p = jnp.pad(b1.astype(jnp.float32), (0, pad_h)).reshape(1, Hp)
    w2_p = jnp.pad(w2.astype(jnp.float32),
                   ((0, pad_h), (0, pad_h))).astype(jnp.bfloat16)
    b2_p = jnp.pad(b2.astype(jnp.float32), (0, pad_h)).reshape(1, Hp)
    w3_col = jnp.pad(w3.astype(jnp.float32),
                     ((0, pad_h), (0, 0))).astype(jnp.bfloat16)     # (Hp, 1)
    b3_p = b3.astype(jnp.float32).reshape(1, 1)

    # --- activation streams (bf16 in HBM; done folded into action) ----------
    state_b = state.astype(jnp.bfloat16)
    next_state_b = next_state.astype(jnp.bfloat16)
    act_done_b = jnp.concatenate(
        [action.astype(jnp.bfloat16),
         done.astype(jnp.bfloat16).reshape(-1, 1)], axis=1)          # (B, act+1)
    ad_dim = act_dim + 1

    # --- batch tiling: no wrapper-side pad; ragged last tile is masked ------
    TB = _round_up(int(min(tile_batch, _round_up(B, 8))), 8)
    num_tiles = pl.cdiv(B, TB)

    # --- cost estimate (advisory; bf16 inputs + f32 output accounted) -------
    d_in = 2 * obs_dim + ad_dim
    flops = 2 * B * (d_in * Hp + Hp * Hp + Hp) + 4 * B * Hp
    bytes_accessed = (2 * B * d_in                                    # bf16 acts
                      + 2 * (d_in * Hp + Hp * Hp + Hp)                # bf16 weights
                      + 4 * (2 * Hp + 1)                              # f32 biases
                      + 4 * B)                                        # f32 rewards
    cost = pl.CostEstimate(flops=int(flops), transcendentals=0,
                           bytes_accessed=int(bytes_accessed))

    grid_spec = pltpu.PrefetchScalarGridSpec(
        num_scalar_prefetch=0,
        grid=(num_tiles,),
        in_specs=[
            pl.BlockSpec((TB, obs_dim), lambda i: (i, 0)),    # state tile
            pl.BlockSpec((TB, ad_dim), lambda i: (i, 0)),     # action+done tile
            pl.BlockSpec((TB, obs_dim), lambda i: (i, 0)),    # next_state tile
            pl.BlockSpec((obs_dim, Hp), lambda i: (0, 0)),    # W1 state slab (resident)
            pl.BlockSpec((ad_dim, Hp), lambda i: (0, 0)),     # W1 action+done slab
            pl.BlockSpec((obs_dim, Hp), lambda i: (0, 0)),    # W1 next_state slab
            pl.BlockSpec((1, Hp), lambda i: (0, 0)),          # b1
            pl.BlockSpec((Hp, Hp), lambda i: (0, 0)),         # W2
            pl.BlockSpec((1, Hp), lambda i: (0, 0)),          # b2
            pl.BlockSpec((Hp, 1), lambda i: (0, 0)),          # W3 column
            pl.BlockSpec((1, 1), lambda i: (0, 0)),           # b3
        ],
        out_specs=pl.BlockSpec((TB, 1), lambda i: (i, 0)),    # per-row rewards
    )

    out = pl.pallas_call(
        _reward_mlp_kernel,
        out_shape=jax.ShapeDtypeStruct((B, 1), jnp.float32),
        grid_spec=grid_spec,
        compiler_params=pltpu.CompilerParams(
            dimension_semantics=("parallel",),
            vmem_limit_bytes=32 * 1024 * 1024),
        cost_estimate=cost,
    )(state_b, act_done_b, next_state_b,
      w1_s, w1_ad, w1_ns, b1_p, w2_p, b2_p, w3_col, b3_p)

    # Reward per transition: shape (batch,), matching RewardNet's contract.
    return out.reshape(-1)


def init_params(key, d_in, hidden):
    """Deterministic Xavier-ish init for the 3-layer MLP."""
    k1, k2, k3 = jax.random.split(key, 3)
    w1 = jax.random.normal(k1, (d_in, hidden), jnp.float32) / jnp.sqrt(d_in)
    b1 = jnp.zeros((hidden,), jnp.float32)
    w2 = jax.random.normal(k2, (hidden, hidden), jnp.float32) / jnp.sqrt(hidden)
    b2 = jnp.zeros((hidden,), jnp.float32)
    w3 = jax.random.normal(k3, (hidden, 1), jnp.float32) / jnp.sqrt(hidden)
    b3 = jnp.zeros((1,), jnp.float32)
    return (w1, b1, w2, b2, w3, b3)


if __name__ == "__main__":
    key = jax.random.PRNGKey(0)
    k_s, k_a, k_ns, k_d, k_p = jax.random.split(key, 5)

    B, OBS, ACT, HIDDEN = 8, 16, 4, 32

    state = jax.random.normal(k_s, (B, OBS), jnp.float32)
    action = jax.random.normal(k_a, (B, ACT), jnp.float32)
    next_state = jax.random.normal(k_ns, (B, OBS), jnp.float32)
    done = (jax.random.uniform(k_d, (B,)) > 0.5).astype(jnp.float32)

    d_in = OBS + ACT + OBS + 1
    params = init_params(k_p, d_in, HIDDEN)

    # Pure-JAX f32 reference of the original (BasicRewardNet-style) forward.
    def ref_forward(s, a, ns, d):
        x = jnp.concatenate([s, a, ns, d.reshape(-1, 1)], axis=1)
        w1, b1, w2, b2, w3, b3 = params
        h1 = jnp.maximum(x @ w1 + b1, 0.0)
        h2 = jnp.maximum(h1 @ w2 + b2, 0.0)
        return (h2 @ w3 + b3)[:, 0]

    rew = jax.block_until_ready(
        reward_net_forward(state, action, next_state, done, params))
    assert rew.shape == (B,), rew.shape
    ref = ref_forward(state, action, next_state, done)
    # bf16 MXU operands -> slightly looser tolerance than pure-f32.
    assert jnp.allclose(rew, ref, atol=5e-2, rtol=5e-2)

    # Ragged-batch / multi-tile path (B not a multiple of the tile, 2 tiles).
    B2 = 100
    q_s, q_a, q_ns, q_d = jax.random.split(jax.random.PRNGKey(1), 4)
    state2 = jax.random.normal(q_s, (B2, OBS), jnp.float32)
    action2 = jax.random.normal(q_a, (B2, ACT), jnp.float32)
    next_state2 = jax.random.normal(q_ns, (B2, OBS), jnp.float32)
    done2 = (jax.random.uniform(q_d, (B2,)) > 0.5).astype(jnp.float32)
    rew2 = jax.block_until_ready(
        reward_net_forward(state2, action2, next_state2, done2, params,
                           tile_batch=64))
    ref2 = ref_forward(state2, action2, next_state2, done2)
    assert rew2.shape == (B2,), rew2.shape
    assert jnp.allclose(rew2, ref2, atol=5e-2, rtol=5e-2)

    print("KERNEL_OK")
</pallas_src>

<mosaic_0001>
module attributes {stable_mosaic.version = 11 : i64} {
  func.func @_reward_mlp_kernel(%arg0: i32, %arg1: memref<8x16xbf16, #tpu.memory_space<vmem>>, %arg2: memref<8x5xbf16, #tpu.memory_space<vmem>>, %arg3: memref<8x16xbf16, #tpu.memory_space<vmem>>, %arg4: memref<16x128xbf16, #tpu.memory_space<vmem>>, %arg5: memref<5x128xbf16, #tpu.memory_space<vmem>>, %arg6: memref<16x128xbf16, #tpu.memory_space<vmem>>, %arg7: memref<1x128xf32, #tpu.memory_space<vmem>>, %arg8: memref<128x128xbf16, #tpu.memory_space<vmem>>, %arg9: memref<1x128xf32, #tpu.memory_space<vmem>>, %arg10: memref<128x1xbf16, #tpu.memory_space<vmem>>, %arg11: memref<1x1xf32, #tpu.memory_space<vmem>>, %arg12: memref<8x1xf32, #tpu.memory_space<vmem>>) attributes {dimension_semantics = [#tpu.dimension_semantics<parallel>], iteration_bounds = array<i64: 1>, scalar_prefetch = 0 : i64, scratch_operands = 0 : i64, tpu.core_type = #tpu.core_type<tc>, window_params = [{transform_indices = @transform_0, window_bounds = array<i64: 8, 16>}, {transform_indices = @transform_1, window_bounds = array<i64: 8, 5>}, {transform_indices = @transform_2, window_bounds = array<i64: 8, 16>}, {pipeline_mode = #tpu.pipeline_mode<synchronous>, transform_indices = @transform_3, window_bounds = array<i64: 16, 128>}, {pipeline_mode = #tpu.pipeline_mode<synchronous>, transform_indices = @transform_4, window_bounds = array<i64: 5, 128>}, {pipeline_mode = #tpu.pipeline_mode<synchronous>, transform_indices = @transform_5, window_bounds = array<i64: 16, 128>}, {pipeline_mode = #tpu.pipeline_mode<synchronous>, transform_indices = @transform_6, window_bounds = array<i64: 1, 128>}, {pipeline_mode = #tpu.pipeline_mode<synchronous>, transform_indices = @transform_7, window_bounds = array<i64: 128, 128>}, {pipeline_mode = #tpu.pipeline_mode<synchronous>, transform_indices = @transform_8, window_bounds = array<i64: 1, 128>}, {pipeline_mode = #tpu.pipeline_mode<synchronous>, transform_indices = @transform_9, window_bounds = array<i64: 128, 1>}, {pipeline_mode = #tpu.pipeline_mode<synchronous>, transform_indices = @transform_10, window_bounds = array<i64: 1, 1>}, {transform_indices = @transform_11, window_bounds = array<i64: 8, 1>}]} {
    %c0 = arith.constant 0 : index
    %c0_0 = arith.constant 0 : index
    %0 = vector.load %arg1[%c0, %c0_0] : memref<8x16xbf16, #tpu.memory_space<vmem>>, vector<8x16xbf16>
    %c0_1 = arith.constant 0 : index
    %c0_2 = arith.constant 0 : index
    %1 = vector.load %arg4[%c0_1, %c0_2] : memref<16x128xbf16, #tpu.memory_space<vmem>>, vector<16x128xbf16>
    %cst = arith.constant dense<0.000000e+00> : vector<8x128xf32>
    %2 = tpu.matmul %0, %1, %cst {dimension_numbers = #tpu.dot_dimension_numbers<[1], [0], [0], [1], [0, 0, 1, 1], [], []>} : vector<8x16xbf16>, vector<16x128xbf16>, vector<8x128xf32> -> vector<8x128xf32>
    %c0_3 = arith.constant 0 : index
    %c0_4 = arith.constant 0 : index
    %3 = vector.load %arg2[%c0_3, %c0_4] : memref<8x5xbf16, #tpu.memory_space<vmem>>, vector<8x5xbf16>
    %c0_5 = arith.constant 0 : index
    %c0_6 = arith.constant 0 : index
    %4 = vector.load %arg5[%c0_5, %c0_6] : memref<5x128xbf16, #tpu.memory_space<vmem>>, vector<5x128xbf16>
    %cst_7 = arith.constant dense<0.000000e+00> : vector<8x128xf32>
    %5 = tpu.matmul %3, %4, %cst_7 {dimension_numbers = #tpu.dot_dimension_numbers<[1], [0], [0], [1], [0, 0, 1, 1], [], []>} : vector<8x5xbf16>, vector<5x128xbf16>, vector<8x128xf32> -> vector<8x128xf32>
    %6 = arith.addf %2, %5 : vector<8x128xf32>
    %c0_8 = arith.constant 0 : index
    %c0_9 = arith.constant 0 : index
    %7 = vector.load %arg3[%c0_8, %c0_9] : memref<8x16xbf16, #tpu.memory_space<vmem>>, vector<8x16xbf16>
    %c0_10 = arith.constant 0 : index
    %c0_11 = arith.constant 0 : index
    %8 = vector.load %arg6[%c0_10, %c0_11] : memref<16x128xbf16, #tpu.memory_space<vmem>>, vector<16x128xbf16>
    %cst_12 = arith.constant dense<0.000000e+00> : vector<8x128xf32>
    %9 = tpu.matmul %7, %8, %cst_12 {dimension_numbers = #tpu.dot_dimension_numbers<[1], [0], [0], [1], [0, 0, 1, 1], [], []>} : vector<8x16xbf16>, vector<16x128xbf16>, vector<8x128xf32> -> vector<8x128xf32>
    %10 = arith.addf %6, %9 : vector<8x128xf32>
    %c0_13 = arith.constant 0 : index
    %c0_14 = arith.constant 0 : index
    %11 = vector.load %arg7[%c0_13, %c0_14] : memref<1x128xf32, #tpu.memory_space<vmem>>, vector<1x128xf32>
    %12 = vector.broadcast %11 : vector<1x128xf32> to vector<8x128xf32>
    %13 = arith.addf %10, %12 : vector<8x128xf32>
    %cst_15 = arith.constant 0.000000e+00 : f32
    %14 = vector.broadcast %cst_15 : f32 to vector<8x128xf32>
    %15 = arith.maximumf %13, %14 : vector<8x128xf32>
    %16 = arith.truncf %15 : vector<8x128xf32> to vector<8x128xbf16>
    %c0_16 = arith.constant 0 : index
    %c0_17 = arith.constant 0 : index
    %17 = vector.load %arg8[%c0_16, %c0_17] : memref<128x128xbf16, #tpu.memory_space<vmem>>, vector<128x128xbf16>
    %cst_18 = arith.constant dense<0.000000e+00> : vector<8x128xf32>
    %18 = tpu.matmul %16, %17, %cst_18 {dimension_numbers = #tpu.dot_dimension_numbers<[1], [0], [0], [1], [0, 0, 1, 1], [], []>} : vector<8x128xbf16>, vector<128x128xbf16>, vector<8x128xf32> -> vector<8x128xf32>
    %c0_19 = arith.constant 0 : index
    %c0_20 = arith.constant 0 : index
    %19 = vector.load %arg9[%c0_19, %c0_20] : memref<1x128xf32, #tpu.memory_space<vmem>>, vector<1x128xf32>
    %20 = vector.broadcast %19 : vector<1x128xf32> to vector<8x128xf32>
    %21 = arith.addf %18, %20 : vector<8x128xf32>
    %cst_21 = arith.constant 0.000000e+00 : f32
    %22 = vector.broadcast %cst_21 : f32 to vector<8x128xf32>
    %23 = arith.maximumf %21, %22 : vector<8x128xf32>
    %24 = arith.truncf %23 : vector<8x128xf32> to vector<8x128xbf16>
    %c0_22 = arith.constant 0 : index
    %c0_23 = arith.constant 0 : index
    %25 = vector.load %arg10[%c0_22, %c0_23] : memref<128x1xbf16, #tpu.memory_space<vmem>>, vector<128x1xbf16>
    %cst_24 = arith.constant dense<0.000000e+00> : vector<8x1xf32>
    %26 = tpu.matmul %24, %25, %cst_24 {dimension_numbers = #tpu.dot_dimension_numbers<[1], [0], [0], [1], [0, 0, 1, 1], [], []>} : vector<8x128xbf16>, vector<128x1xbf16>, vector<8x1xf32> -> vector<8x1xf32>
    %c0_25 = arith.constant 0 : index
    %c0_26 = arith.constant 0 : index
    %27 = vector.load %arg11[%c0_25, %c0_26] : memref<1x1xf32, #tpu.memory_space<vmem>>, vector<1x1xf32>
    %28 = vector.broadcast %27 : vector<1x1xf32> to vector<8x1xf32>
    %29 = arith.addf %26, %28 : vector<8x1xf32>
    %c0_27 = arith.constant 0 : index
    %c0_28 = arith.constant 0 : index
    %30 = vector.load %arg12[%c0_27, %c0_28] : memref<8x1xf32, #tpu.memory_space<vmem>>, vector<8x1xf32>
    tpu.vector_store %arg12[%c0_27, %c0_28], %29 {strides = array<i32>} : memref<8x1xf32, #tpu.memory_space<vmem>>, vector<8x1xf32>,
    return
  }
  func.func @transform_0(%arg0: i32) -> (i32, i32) {
    %c0_i32 = arith.constant 0 : i32
    %c0_i32_0 = arith.constant 0 : i32
    return %arg0, %c0_i32 : i32, i32
  }
  func.func @transform_1(%arg0: i32) -> (i32, i32) {
    %c0_i32 = arith.constant 0 : i32
    %c0_i32_0 = arith.constant 0 : i32
    return %arg0, %c0_i32 : i32, i32
  }
  func.func @transform_2(%arg0: i32) -> (i32, i32) {
    %c0_i32 = arith.constant 0 : i32
    %c0_i32_0 = arith.constant 0 : i32
    return %arg0, %c0_i32 : i32, i32
  }
  func.func @transform_3(%arg0: i32) -> (i32, i32) {
    %c0_i32 = arith.constant 0 : i32
    %c0_i32_0 = arith.constant 0 : i32
    %c0_i32_1 = arith.constant 0 : i32
    return %c0_i32, %c0_i32_0 : i32, i32
  }
  func.func @transform_4(%arg0: i32) -> (i32, i32) {
    %c0_i32 = arith.constant 0 : i32
    %c0_i32_0 = arith.constant 0 : i32
    %c0_i32_1 = arith.constant 0 : i32
    return %c0_i32, %c0_i32_0 : i32, i32
  }
  func.func @transform_5(%arg0: i32) -> (i32, i32) {
    %c0_i32 = arith.constant 0 : i32
    %c0_i32_0 = arith.constant 0 : i32
    %c0_i32_1 = arith.constant 0 : i32
    return %c0_i32, %c0_i32_0 : i32, i32
  }
  func.func @transform_6(%arg0: i32) -> (i32, i32) {
    %c0_i32 = arith.constant 0 : i32
    %c0_i32_0 = arith.constant 0 : i32
    %c0_i32_1 = arith.constant 0 : i32
    return %c0_i32, %c0_i32_0 : i32, i32
  }
  func.func @transform_7(%arg0: i32) -> (i32, i32) {
    %c0_i32 = arith.constant 0 : i32
    %c0_i32_0 = arith.constant 0 : i32
    %c0_i32_1 = arith.constant 0 : i32
    return %c0_i32, %c0_i32_0 : i32, i32
  }
  func.func @transform_8(%arg0: i32) -> (i32, i32) {
    %c0_i32 = arith.constant 0 : i32
    %c0_i32_0 = arith.constant 0 : i32
    %c0_i32_1 = arith.constant 0 : i32
    return %c0_i32, %c0_i32_0 : i32, i32
  }
  func.func @transform_9(%arg0: i32) -> (i32, i32) {
    %c0_i32 = arith.constant 0 : i32
    %c0_i32_0 = arith.constant 0 : i32
    %c0_i32_1 = arith.constant 0 : i32
    return %c0_i32, %c0_i32_0 : i32, i32
  }
  func.func @transform_10(%arg0: i32) -> (i32, i32) {
    %c0_i32 = arith.constant 0 : i32
    %c0_i32_0 = arith.constant 0 : i32
    %c0_i32_1 = arith.constant 0 : i32
    return %c0_i32, %c0_i32_0 : i32, i32
  }
  func.func @transform_11(%arg0: i32) -> (i32, i32) {
    %c0_i32 = arith.constant 0 : i32
    %c0_i32_0 = arith.constant 0 : i32
    return %arg0, %c0_i32 : i32, i32
  }
}

</mosaic_0001>

<bundles_post_ra>
// kernel: reward_net_forward.1
= control target key start
LH: loop header
LB: loop body
LE: loop exit
PB: predicated region body
PF: predicated region fallthrough
CT: control target
= control target key end

     0   :  { %vm50_vm0 = vcmask 1041408   ;;  %vm51_vm1 = vcmask 1042432   ;;  %v393_v1 = vmov 65535   ;;  %vm76_vm2 = vcmask 130048   ;;  %s532_s4 = inlined_call_operand.vmem [shape: bf16[5,128], index: 4, kind: input, shape index: {}]   ;;  %s533_s3 = inlined_call_operand.vmem [shape: bf16[16,128], index: 3, kind: input, shape index: {}]   ;;  %s534_s5 = inlined_call_operand.vmem [shape: bf16[16,128], index: 5, kind: input, shape index: {}]   ;;  %s535_s7 = inlined_call_operand.vmem [shape: bf16[128,128], index: 7, kind: input, shape index: {}]   ;;  %s536_s2 = inlined_call_operand.vmem [shape: bf16[8,16], index: 2, kind: input, shape index: {}]   ;;  %s537_s1 = inlined_call_operand.vmem [shape: bf16[8,5], index: 1, kind: input, shape index: {}]   ;;  %s538_s0 = inlined_call_operand.vmem [shape: bf16[8,16], index: 0, kind: input, shape index: {}]   ;;  %s539_s6 = inlined_call_operand.vmem [shape: f32[1,128], index: 6, kind: input, shape index: {}]   ;;  %s540_s8 = inlined_call_operand.vmem [shape: f32[1,128], index: 8, kind: input, shape index: {}]   ;;  %s541_s9 = inlined_call_operand.vmem [shape: bf16[128,1], index: 9, kind: input, shape index: {}]   ;;  %s542_s10 = inlined_call_operand.<no memory space> [shape: f32[1,1], index: 10, kind: input, shape index: {}]   ;;  %s543_s11 = inlined_call_operand.vmem [shape: f32[8,1], index: 11, kind: output, shape index: {}]  }
   0x1   :  { %v45_v0 = vld [vmem:[%s532_s4] sm:$0x7]  ;;  %v52_v2 = vsel %vm50_vm0, 4294967295, %v393_v1  ;;  %v380_v6 = vld [vmem:[%s535_s7 + $0x38] sm:$0xff]  ;;  %vm46_vm3 = vcmask 39936   ;;  %v379_v11 = vld [vmem:[%s535_s7 + $0x30] sm:$0xff]  ;;  %v16_v38 = vstv %s542_s10 }
   0x2   :  { %v53_v3 = vsel %vm51_vm1, %v52_v2, 0  ;;  %v371_v4 = vld [vmem:[%s533_s3] sm:$0xff]  ;;  %194 = vmatpush.bf16.msra.mxu3 %v380_v6  ;;  %v378_v12 = vld [vmem:[%s535_s7 + $0x28] sm:$0xff]  ;;  %v376_v14 = vld [vmem:[%s535_s7 + $0x18] sm:$0xff]  ;;  %17 = vst [vmem:[#allocation2] sm:$0x1] %v16_v38 }
   0x3   :  { %v372_v5 = vld [vmem:[%s534_s5] sm:$0xff]  ;;  %v55_v7 = vand.u32 %v53_v3, %v45_v0  ;;  %v375_v15 = vld [vmem:[%s535_s7 + $0x10] sm:$0xff]  ;;  %v374_v16 = vld [vmem:[%s535_s7 + $0x8] sm:$0xff]  ;;  %vm290_vm4 = vcmask 7168  }
   0x4   :  { %112 = vmatpush.bf16.msra.mxu2 %v372_v5  ;;  %v93_v8 = vld [vmem:[%s536_s2] sm:$0xf]  ;;  %v388_v18 = vld [vmem:[%s541_s9 + $0x38] sm:$0xff]  ;;  %v387_v19 = vld [vmem:[%s541_s9 + $0x30] sm:$0xff] }
   0x5   :  { %64 = vmatpush.bf16.msra.mxu1 %v55_v7  ;;  %v44_v9 = vld [vmem:[%s537_s1] sm:$0xf]  ;;  %277 = vmatpush.bf16.msra.mxu0 %v388_v18  ;;  %v386_v21 = vld [vmem:[%s541_s9 + $0x28] sm:$0xff]  ;;  %v384_v25 = vld [vmem:[%s541_s9 + $0x18] sm:$0xff] }
   0x6   :  { %v41_v10 = vld [vmem:[%s538_s0] sm:$0xf]  ;;  %195 = vmatpush.bf16.msra.mxu3 %v379_v11  ;;  %v383_v27 = vld [vmem:[%s541_s9 + $0x10] sm:$0xff]  ;;  %v382_v36 = vld [vmem:[%s541_s9 + $0x8] sm:$0xff] }
   0x7   :  { %306 = vmatmul.msk.bf16.vlgmr.msra.gmra.mxu2 %vm76_vm2, %v93_v8  ;;  %v377_v13 = vld [vmem:[%s535_s7 + $0x20] sm:$0xff] }
   0x8   :  { %296 = vmatmul.msk.bf16.vlgmr.msra.gmra.mxu1 %vm46_vm3, %v44_v9  ;;  %v373_v17 = vld [vmem:[%s535_s7] sm:$0xff] }
   0x9   :  { %87 = vmatpush.bf16.msrb.mxu1 %v371_v4  ;;  %278 = vmatpush.bf16.msra.mxu0 %v387_v19  ;;  %v385_v23 = vld [vmem:[%s541_s9 + $0x20] sm:$0xff] }
   0xa   :  { %196 = vmatpush.bf16.msra.mxu3 %v378_v12  ;;  %v390_v30 = vld [vmem:[%s539_s6] ss:$0 sm:$0xff] }
   0xb   :  { %v381_v37 = vld [vmem:[%s541_s9] sm:$0xff] }
   0xc   :  { %v391_v39 = vld [vmem:[%s540_s8] ss:$0 sm:$0xff] }
   0xd   :  { %279 = vmatpush.bf16.msra.mxu0 %v386_v21  ;;  %v392_v45 = vld [vmem:[#allocation2] ss:$0 sm:$0xff] }
   0xe   :  { %197 = vmatpush.bf16.msra.mxu3 %v377_v13 }
  0x11   :  { %280 = vmatpush.bf16.msra.mxu0 %v385_v23 }
  0x12   :  { %198 = vmatpush.bf16.msra.mxu3 %v376_v14 }
  0x15   :  { %281 = vmatpush.bf16.msra.mxu0 %v384_v25 }
  0x16   :  { %199 = vmatpush.bf16.msra.mxu3 %v375_v15 }
  0x18   :  { %301 = vmatmul.msk.bf16.vlgmr.msrb.gmra.mxu1 %vm76_vm2, %v41_v10 }
  0x19   :  { %282 = vmatpush.bf16.msra.mxu0 %v383_v27 }
  0x1a   :  { %200 = vmatpush.bf16.msra.mxu3 %v374_v16 }
  0x1d   :  { %283 = vmatpush.bf16.msra.mxu0 %v382_v36 }
  0x1e   :  { %201 = vmatpush.bf16.msra.mxu3 %v373_v17 }
  0x21   :  { %284 = vmatpush.bf16.msra.mxu0 %v381_v37 }
  0x85   :  { %v66_v20 = vpop.f32.mrf.mxu1 }
  0x8a   :  { %v114_v22 = vpop.f32.mrf.mxu2 }
  0x8d   :  { %v68_v24 = vpop.f32.mrf.mxu1 }
  0x92   :  { %v116_v26 = vpop.f32.mrf.mxu2 }
  0x95   :  { %v89_v28 = vpop.f32.mrf.mxu1 }
  0x96   :  { %v90_v29 = vadd.f32 %v89_v28, %v66_v20 }
  0x98   :  { %v118_v31 = vadd.f32 %v114_v22, %v90_v29 }
  0x9a   :  { %v123_v32 = vadd.f32 %v390_v30, %v118_v31 }
  0x9c   :  { %v124_v33 = vmax.f32 %v123_v32, 0.0 }
  0x9d   :  { %v91_v34 = vpop.f32.mrf.mxu1 }
  0x9e   :  { %v125_v35 = vpack.c.bf16 %v124_v33, %v124_v33 }
  0xa0   :  { %202 = vmatmul.bf16.vlgmr.msra.gmra.mxu3 %v125_v35 }
 0x123   :  { %v203_v40 = vpop.f32.mrf.mxu3 }
 0x124   :  { %v204_v41 = vadd.f32 %v391_v39, %v203_v40 }
 0x126   :  { %v207_v42 = vmax.f32 %v204_v41, 0.0 }
 0x128   :  { %v208_v43 = vpack.c.bf16 %v207_v42, %v207_v42 }
 0x12a   :  { %285 = vmatmul.bf16.vlgmr.msra.gmra.mxu0 %v208_v43 }
 0x12b   :  { %v205_v44 = vpop.f32.mrf.mxu3 }
 0x1a7   :  { %v286_v46 = vpop.f32.mrf.mxu0 }
 0x1a8   :  { %v287_v47 = vadd.f32 %v392_v45, %v286_v46 }
 0x1aa   :  { %291 = vst.msk [vmem:[%s543_s11] sm:$0xff] %vm290_vm4, %v287_v47 }
 0x1af   :  { %v288_v48 = vpop.f32.mrf.mxu0 }

</bundles_post_ra>
